<compile_context>
chip_gen: v5e
topology: v5e:2x2
jax: 0.10.0
libtpu: 0.0.40
codegen_flags: <defaults>
</compile_context>

<pallas_src>
import functools

import jax
import jax.numpy as jnp
from jax.experimental import pallas as pl
from jax.experimental.pallas import tpu as pltpu


_SMALL_C = 8  # at/below this channel count the VPU path is used


# ---------------------------------------------------------------------------
# Kernels
# ---------------------------------------------------------------------------
def _residual_vpu_kernel(w_smem, b_smem, x_ref, o_ref):
    """Small-C path: unrolled C^2 scalar-broadcast FMAs on the VPU.

    w_smem: (C, C) f32 SMEM, gamma-folded, laid out (out_ch, in_ch)
    b_smem: (C,)   f32 SMEM, gamma-folded
    x_ref / o_ref: (Nb, C, TS) VMEM tiles (C on sublanes, spatial on lanes).
    Computes out = x + (W_g @ x + b_g) with W_g = gamma * W^T, b_g = gamma * b.
    """
    x = x_ref[...].astype(jnp.float32)                       # (Nb, C, TS)
    c = x.shape[1]
    for co in range(c):
        r = x[:, co, :] + b_smem[co]                         # residual x + bias
        for ci in range(c):
            r = r + w_smem[co, ci] * x[:, ci, :]             # broadcast FMA
        o_ref[:, co, :] = r.astype(o_ref.dtype)


def _residual_mxu_kernel(x_ref, w_ref, b_ref, o_ref, *, precision):
    """Large-C path: channel mixing on the MXU.

    x_ref / o_ref: (Nb, C, TS); w_ref: (C_out, C_in) gamma-folded; b_ref: (C, 1).
    """
    w = w_ref[...]
    bcol = b_ref[...]                                        # (C, 1), f32
    for n in range(x_ref.shape[0]):                          # static, small
        xn = x_ref[n]                                        # (C, TS)
        r = jnp.dot(w, xn, preferred_element_type=jnp.float32,
                    precision=precision)
        o_ref[n] = (xn.astype(jnp.float32) + r + bcol).astype(o_ref.dtype)


# ---------------------------------------------------------------------------
# Tiling / budgets
# ---------------------------------------------------------------------------
def _tpu_memory_budget():
    """Return (target_tile_bytes, vmem_limit_cap) for the local TPU generation."""
    try:
        info = pltpu.get_tpu_info()
        cap = int(getattr(info, "vmem_capacity_bytes", 64 << 20))
    except Exception:  # unknown backend: assume the tightest (v7x-like) budget
        cap = 64 << 20
    if cap <= (64 << 20):            # v7x: 64 MiB physical VMEM per TensorCore
        return (3 << 19), (28 << 20)   # ~1.5 MiB tiles, ~28 MiB pipeline cap
    return (3 << 20), (80 << 20)       # v5e / v6e: 128 MiB VMEM, bigger tiles


def _choose_tiling(n, c, s, itemsize, target_bytes):
    """Pick (batch block, spatial tile) so each grid step moves ~target_bytes."""
    per_image_bytes = c * s * itemsize
    if s <= 128 or per_image_bytes <= target_bytes:
        # Spatial tile = full image (contiguous DMA); block over batch too.
        ts = s
        nb = int(max(1, min(n, target_bytes // max(per_image_bytes, 1))))
    else:
        nb = 1
        ts = int(min(s, max(128, (target_bytes // (c * itemsize) // 128) * 128)))
    # Keep >= 2 grid steps when possible so v7x can shard across its 2 TCs.
    if pl.cdiv(n, nb) * pl.cdiv(s, ts) < 2:
        if n >= 2:
            nb = (n + 1) // 2
        elif ts == s and s >= 256:
            ts = max(128, ((s // 2) // 128) * 128)
    return nb, ts


# ---------------------------------------------------------------------------
# Wrapper
# ---------------------------------------------------------------------------
def residual_forward(x_nchw, w, b, gamma):
    """x + gamma * conv1x1(x).  x: (N, C, H, W); w: (C_in, C_out); b: (C,); gamma: (1,)."""
    N, C, H, W = x_nchw.shape
    S = H * W
    x3 = x_nchw.reshape(N, C, S)               # layout-preserving, no transpose
    itemsize = jnp.dtype(x_nchw.dtype).itemsize

    target_tile_bytes, vmem_cap = _tpu_memory_budget()
    nb, ts = _choose_tiling(N, C, S, itemsize, target_tile_bytes)
    if C > _SMALL_C:
        nb = min(nb, 16)                        # MXU kernel unrolls over nb
    grid = (pl.cdiv(N, nb), pl.cdiv(S, ts))

    # Fold gamma into the (tiny) weight/bias on the host: out = x + W_g x + b_g.
    gamma_s = jnp.reshape(gamma.astype(jnp.float32), ())
    wt = jnp.transpose(w).astype(jnp.float32) * gamma_s      # (C_out, C_in)
    bg = b.astype(jnp.float32) * gamma_s                      # (C,)

    x_spec = pl.BlockSpec((nb, C, ts), lambda n, s: (n, 0, s))
    out_spec = pl.BlockSpec((nb, C, ts), lambda n, s: (n, 0, s))

    tile_bytes = nb * C * ts * itemsize
    cost = pl.CostEstimate(
        flops=2 * N * S * C * C + 2 * N * S * C,
        transcendentals=0,
        bytes_accessed=2 * N * C * S * itemsize + (C * C + C) * 4,
    )

    if C <= _SMALL_C:
        # Weights/bias live in SMEM as scalars; C^2 broadcast FMAs on the VPU.
        kernel = _residual_vpu_kernel
        in_specs = [
            pl.BlockSpec(memory_space=pltpu.MemorySpace.SMEM),   # (C, C) weight
            pl.BlockSpec(memory_space=pltpu.MemorySpace.SMEM),   # (C,)  bias
            x_spec,
        ]
        args = (wt, bg, x3)
        vmem_needed = 4 * tile_bytes + 2 * nb * C * ts * 4 + (1 << 20)
    else:
        # MXU path: match weight dtype to x (bf16 stays native bf16xbf16),
        # accumulate f32; force f32-accurate MXU passes for f32 inputs.
        wdt = (jnp.bfloat16 if jnp.dtype(x_nchw.dtype) == jnp.bfloat16
               else jnp.float32)
        precision = (jax.lax.Precision.HIGHEST
                     if jnp.dtype(wdt) == jnp.float32
                     else jax.lax.Precision.DEFAULT)
        kernel = functools.partial(_residual_mxu_kernel, precision=precision)
        w_itemsize = jnp.dtype(wdt).itemsize
        in_specs = [
            x_spec,
            # Grid-invariant weight/bias: single-buffer them (saves VMEM).
            pl.BlockSpec((C, C), lambda n, s: (0, 0),
                         pipeline_mode=pl.Buffered(1)),
            pl.BlockSpec((C, 1), lambda n, s: (0, 0),
                         pipeline_mode=pl.Buffered(1)),
        ]
        args = (x3, wt.astype(wdt), jnp.reshape(bg, (C, 1)))
        vmem_needed = (4 * tile_bytes + 2 * nb * C * ts * 4
                       + C * C * w_itemsize + C * 4 + (1 << 20))

    vmem_limit = int(min(max(2 * vmem_needed, 16 << 20), vmem_cap))

    out3 = pl.pallas_call(
        kernel,
        out_shape=jax.ShapeDtypeStruct((N, C, S), x_nchw.dtype),
        grid_spec=pl.GridSpec(grid=grid, in_specs=in_specs, out_specs=out_spec),
        compiler_params=pltpu.CompilerParams(
            dimension_semantics=("parallel", "parallel"),
            vmem_limit_bytes=vmem_limit,
        ),
        cost_estimate=cost,
    )(*args)

    return out3.reshape(N, C, H, W)


# ---------------------------------------------------------------------------
# Reference & test
# ---------------------------------------------------------------------------
def _reference(x_nchw, w, b, gamma):
    r = jnp.einsum("nchw,co->nohw", x_nchw, w,
                   precision=jax.lax.Precision.HIGHEST) + b[None, :, None, None]
    return x_nchw + gamma * r


if __name__ == "__main__":
    key = jax.random.PRNGKey(0)
    kx, kw, kb, kx2, kw2, kb2 = jax.random.split(key, 6)

    # --- small-C / VPU path (module's example shapes) ---
    N, C, H, W = 2, 4, 16, 16
    x = jax.random.normal(kx, (N, C, H, W), dtype=jnp.float32)
    w = jax.random.normal(kw, (C, C), dtype=jnp.float32) * 0.1    # (C_in, C_out)
    b = jax.random.normal(kb, (C,), dtype=jnp.float32) * 0.1

    gamma0 = jnp.zeros((1,), dtype=jnp.float32)   # module __init__: gamma = 0
    out0 = jax.block_until_ready(residual_forward(x, w, b, gamma0))
    assert jnp.allclose(out0, x, atol=1e-6), "gamma=0 must be identity"

    gamma1 = jnp.array([0.5], dtype=jnp.float32)
    out1 = jax.block_until_ready(residual_forward(x, w, b, gamma1))
    ref1 = _reference(x, w, b, gamma1[0])
    assert jnp.allclose(out1, ref1, atol=1e-5, rtol=1e-5), "VPU path mismatch"

    # --- larger-C / MXU path ---
    N2, C2, H2, W2 = 2, 32, 16, 16
    x2 = jax.random.normal(kx2, (N2, C2, H2, W2), dtype=jnp.float32)
    w2 = jax.random.normal(kw2, (C2, C2), dtype=jnp.float32) * 0.05
    b2 = jax.random.normal(kb2, (C2,), dtype=jnp.float32) * 0.05
    out2 = jax.block_until_ready(residual_forward(x2, w2, b2, gamma1))
    ref2 = _reference(x2, w2, b2, gamma1[0])
    assert jnp.allclose(out2, ref2, atol=1e-4, rtol=1e-4), "MXU path mismatch"

    print("KERNEL_OK")
</pallas_src>

<mosaic_0001>
module attributes {stable_mosaic.version = 11 : i64} {
  func.func @_residual_vpu_kernel(%arg0: i32, %arg1: i32, %arg2: memref<4x4xf32, #tpu.memory_space<smem>>, %arg3: memref<4xf32, #tpu.memory_space<smem>>, %arg4: memref<1x4x256xf32, #tpu.memory_space<vmem>>, %arg5: memref<1x4x256xf32, #tpu.memory_space<vmem>>) attributes {dimension_semantics = [#tpu.dimension_semantics<parallel>, #tpu.dimension_semantics<parallel>], iteration_bounds = array<i64: 2, 1>, scalar_prefetch = 0 : i64, scratch_operands = 0 : i64, tpu.core_type = #tpu.core_type<tc>, window_params = [{transform_indices = @transform_0, window_bounds = array<i64: 4, 4>}, {transform_indices = @transform_1, window_bounds = array<i64: 4>}, {transform_indices = @transform_2, window_bounds = array<i64: 1, 4, 256>}, {transform_indices = @transform_3, window_bounds = array<i64: 1, 4, 256>}]} {
    %c0 = arith.constant 0 : index
    %c0_0 = arith.constant 0 : index
    %c0_1 = arith.constant 0 : index
    %0 = vector.load %arg4[%c0, %c0_0, %c0_1] : memref<1x4x256xf32, #tpu.memory_space<vmem>>, vector<1x4x256xf32>
    %1 = vector.extract_strided_slice %0 {offsets = [0, 0, 0], sizes = [1, 1, 256], strides = [1, 1, 1]} : vector<1x4x256xf32> to vector<1x1x256xf32>
    %2 = vector.shape_cast %1 : vector<1x1x256xf32> to vector<1x256xf32>
    %c0_2 = arith.constant 0 : index
    %3 = memref.load %arg3[%c0_2] : memref<4xf32, #tpu.memory_space<smem>>
    %4 = vector.broadcast %3 : f32 to vector<1x256xf32>
    %5 = arith.addf %2, %4 : vector<1x256xf32>
    %c0_3 = arith.constant 0 : index
    %c0_4 = arith.constant 0 : index
    %6 = memref.load %arg2[%c0_3, %c0_4] : memref<4x4xf32, #tpu.memory_space<smem>>
    %7 = vector.extract_strided_slice %0 {offsets = [0, 0, 0], sizes = [1, 1, 256], strides = [1, 1, 1]} : vector<1x4x256xf32> to vector<1x1x256xf32>
    %8 = vector.shape_cast %7 : vector<1x1x256xf32> to vector<1x256xf32>
    %9 = vector.broadcast %6 : f32 to vector<1x256xf32>
    %10 = arith.mulf %9, %8 : vector<1x256xf32>
    %11 = arith.addf %5, %10 : vector<1x256xf32>
    %c0_5 = arith.constant 0 : index
    %c1 = arith.constant 1 : index
    %12 = memref.load %arg2[%c0_5, %c1] : memref<4x4xf32, #tpu.memory_space<smem>>
    %13 = vector.extract_strided_slice %0 {offsets = [0, 1, 0], sizes = [1, 1, 256], strides = [1, 1, 1]} : vector<1x4x256xf32> to vector<1x1x256xf32>
    %14 = vector.shape_cast %13 : vector<1x1x256xf32> to vector<1x256xf32>
    %15 = vector.broadcast %12 : f32 to vector<1x256xf32>
    %16 = arith.mulf %15, %14 : vector<1x256xf32>
    %17 = arith.addf %11, %16 : vector<1x256xf32>
    %c0_6 = arith.constant 0 : index
    %c2 = arith.constant 2 : index
    %18 = memref.load %arg2[%c0_6, %c2] : memref<4x4xf32, #tpu.memory_space<smem>>
    %19 = vector.extract_strided_slice %0 {offsets = [0, 2, 0], sizes = [1, 1, 256], strides = [1, 1, 1]} : vector<1x4x256xf32> to vector<1x1x256xf32>
    %20 = vector.shape_cast %19 : vector<1x1x256xf32> to vector<1x256xf32>
    %21 = vector.broadcast %18 : f32 to vector<1x256xf32>
    %22 = arith.mulf %21, %20 : vector<1x256xf32>
    %23 = arith.addf %17, %22 : vector<1x256xf32>
    %c0_7 = arith.constant 0 : index
    %c3 = arith.constant 3 : index
    %24 = memref.load %arg2[%c0_7, %c3] : memref<4x4xf32, #tpu.memory_space<smem>>
    %25 = vector.extract_strided_slice %0 {offsets = [0, 3, 0], sizes = [1, 1, 256], strides = [1, 1, 1]} : vector<1x4x256xf32> to vector<1x1x256xf32>
    %26 = vector.shape_cast %25 : vector<1x1x256xf32> to vector<1x256xf32>
    %27 = vector.broadcast %24 : f32 to vector<1x256xf32>
    %28 = arith.mulf %27, %26 : vector<1x256xf32>
    %29 = arith.addf %23, %28 : vector<1x256xf32>
    %c0_8 = arith.constant 0 : index
    %c0_9 = arith.constant 0 : index
    %c0_10 = arith.constant 0 : index
    %30 = vector.load %arg5[%c0_8, %c0_9, %c0_10] : memref<1x4x256xf32, #tpu.memory_space<vmem>>, vector<1x1x256xf32>
    %31 = vector.shape_cast %30 : vector<1x1x256xf32> to vector<1x256xf32>
    %32 = vector.shape_cast %29 : vector<1x256xf32> to vector<1x1x256xf32>
    tpu.vector_store %arg5[%c0_8, %c0_9, %c0_10], %32 {strides = array<i32>} : memref<1x4x256xf32, #tpu.memory_space<vmem>>, vector<1x1x256xf32>,
    %33 = vector.extract_strided_slice %0 {offsets = [0, 1, 0], sizes = [1, 1, 256], strides = [1, 1, 1]} : vector<1x4x256xf32> to vector<1x1x256xf32>
    %34 = vector.shape_cast %33 : vector<1x1x256xf32> to vector<1x256xf32>
    %c1_11 = arith.constant 1 : index
    %35 = memref.load %arg3[%c1_11] : memref<4xf32, #tpu.memory_space<smem>>
    %36 = vector.broadcast %35 : f32 to vector<1x256xf32>
    %37 = arith.addf %34, %36 : vector<1x256xf32>
    %c1_12 = arith.constant 1 : index
    %c0_13 = arith.constant 0 : index
    %38 = memref.load %arg2[%c1_12, %c0_13] : memref<4x4xf32, #tpu.memory_space<smem>>
    %39 = vector.extract_strided_slice %0 {offsets = [0, 0, 0], sizes = [1, 1, 256], strides = [1, 1, 1]} : vector<1x4x256xf32> to vector<1x1x256xf32>
    %40 = vector.shape_cast %39 : vector<1x1x256xf32> to vector<1x256xf32>
    %41 = vector.broadcast %38 : f32 to vector<1x256xf32>
    %42 = arith.mulf %41, %40 : vector<1x256xf32>
    %43 = arith.addf %37, %42 : vector<1x256xf32>
    %c1_14 = arith.constant 1 : index
    %c1_15 = arith.constant 1 : index
    %44 = memref.load %arg2[%c1_14, %c1_15] : memref<4x4xf32, #tpu.memory_space<smem>>
    %45 = vector.extract_strided_slice %0 {offsets = [0, 1, 0], sizes = [1, 1, 256], strides = [1, 1, 1]} : vector<1x4x256xf32> to vector<1x1x256xf32>
    %46 = vector.shape_cast %45 : vector<1x1x256xf32> to vector<1x256xf32>
    %47 = vector.broadcast %44 : f32 to vector<1x256xf32>
    %48 = arith.mulf %47, %46 : vector<1x256xf32>
    %49 = arith.addf %43, %48 : vector<1x256xf32>
    %c1_16 = arith.constant 1 : index
    %c2_17 = arith.constant 2 : index
    %50 = memref.load %arg2[%c1_16, %c2_17] : memref<4x4xf32, #tpu.memory_space<smem>>
    %51 = vector.extract_strided_slice %0 {offsets = [0, 2, 0], sizes = [1, 1, 256], strides = [1, 1, 1]} : vector<1x4x256xf32> to vector<1x1x256xf32>
    %52 = vector.shape_cast %51 : vector<1x1x256xf32> to vector<1x256xf32>
    %53 = vector.broadcast %50 : f32 to vector<1x256xf32>
    %54 = arith.mulf %53, %52 : vector<1x256xf32>
    %55 = arith.addf %49, %54 : vector<1x256xf32>
    %c1_18 = arith.constant 1 : index
    %c3_19 = arith.constant 3 : index
    %56 = memref.load %arg2[%c1_18, %c3_19] : memref<4x4xf32, #tpu.memory_space<smem>>
    %57 = vector.extract_strided_slice %0 {offsets = [0, 3, 0], sizes = [1, 1, 256], strides = [1, 1, 1]} : vector<1x4x256xf32> to vector<1x1x256xf32>
    %58 = vector.shape_cast %57 : vector<1x1x256xf32> to vector<1x256xf32>
    %59 = vector.broadcast %56 : f32 to vector<1x256xf32>
    %60 = arith.mulf %59, %58 : vector<1x256xf32>
    %61 = arith.addf %55, %60 : vector<1x256xf32>
    %c0_20 = arith.constant 0 : index
    %c1_21 = arith.constant 1 : index
    %c0_22 = arith.constant 0 : index
    %62 = vector.load %arg5[%c0_20, %c1_21, %c0_22] : memref<1x4x256xf32, #tpu.memory_space<vmem>>, vector<1x1x256xf32>
    %63 = vector.shape_cast %62 : vector<1x1x256xf32> to vector<1x256xf32>
    %64 = vector.shape_cast %61 : vector<1x256xf32> to vector<1x1x256xf32>
    tpu.vector_store %arg5[%c0_20, %c1_21, %c0_22], %64 {strides = array<i32>} : memref<1x4x256xf32, #tpu.memory_space<vmem>>, vector<1x1x256xf32>,
    %65 = vector.extract_strided_slice %0 {offsets = [0, 2, 0], sizes = [1, 1, 256], strides = [1, 1, 1]} : vector<1x4x256xf32> to vector<1x1x256xf32>
    %66 = vector.shape_cast %65 : vector<1x1x256xf32> to vector<1x256xf32>
    %c2_23 = arith.constant 2 : index
    %67 = memref.load %arg3[%c2_23] : memref<4xf32, #tpu.memory_space<smem>>
    %68 = vector.broadcast %67 : f32 to vector<1x256xf32>
    %69 = arith.addf %66, %68 : vector<1x256xf32>
    %c2_24 = arith.constant 2 : index
    %c0_25 = arith.constant 0 : index
    %70 = memref.load %arg2[%c2_24, %c0_25] : memref<4x4xf32, #tpu.memory_space<smem>>
    %71 = vector.extract_strided_slice %0 {offsets = [0, 0, 0], sizes = [1, 1, 256], strides = [1, 1, 1]} : vector<1x4x256xf32> to vector<1x1x256xf32>
    %72 = vector.shape_cast %71 : vector<1x1x256xf32> to vector<1x256xf32>
    %73 = vector.broadcast %70 : f32 to vector<1x256xf32>
    %74 = arith.mulf %73, %72 : vector<1x256xf32>
    %75 = arith.addf %69, %74 : vector<1x256xf32>
    %c2_26 = arith.constant 2 : index
    %c1_27 = arith.constant 1 : index
    %76 = memref.load %arg2[%c2_26, %c1_27] : memref<4x4xf32, #tpu.memory_space<smem>>
    %77 = vector.extract_strided_slice %0 {offsets = [0, 1, 0], sizes = [1, 1, 256], strides = [1, 1, 1]} : vector<1x4x256xf32> to vector<1x1x256xf32>
    %78 = vector.shape_cast %77 : vector<1x1x256xf32> to vector<1x256xf32>
    %79 = vector.broadcast %76 : f32 to vector<1x256xf32>
    %80 = arith.mulf %79, %78 : vector<1x256xf32>
    %81 = arith.addf %75, %80 : vector<1x256xf32>
    %c2_28 = arith.constant 2 : index
    %c2_29 = arith.constant 2 : index
    %82 = memref.load %arg2[%c2_28, %c2_29] : memref<4x4xf32, #tpu.memory_space<smem>>
    %83 = vector.extract_strided_slice %0 {offsets = [0, 2, 0], sizes = [1, 1, 256], strides = [1, 1, 1]} : vector<1x4x256xf32> to vector<1x1x256xf32>
    %84 = vector.shape_cast %83 : vector<1x1x256xf32> to vector<1x256xf32>
    %85 = vector.broadcast %82 : f32 to vector<1x256xf32>
    %86 = arith.mulf %85, %84 : vector<1x256xf32>
    %87 = arith.addf %81, %86 : vector<1x256xf32>
    %c2_30 = arith.constant 2 : index
    %c3_31 = arith.constant 3 : index
    %88 = memref.load %arg2[%c2_30, %c3_31] : memref<4x4xf32, #tpu.memory_space<smem>>
    %89 = vector.extract_strided_slice %0 {offsets = [0, 3, 0], sizes = [1, 1, 256], strides = [1, 1, 1]} : vector<1x4x256xf32> to vector<1x1x256xf32>
    %90 = vector.shape_cast %89 : vector<1x1x256xf32> to vector<1x256xf32>
    %91 = vector.broadcast %88 : f32 to vector<1x256xf32>
    %92 = arith.mulf %91, %90 : vector<1x256xf32>
    %93 = arith.addf %87, %92 : vector<1x256xf32>
    %c0_32 = arith.constant 0 : index
    %c2_33 = arith.constant 2 : index
    %c0_34 = arith.constant 0 : index
    %94 = vector.load %arg5[%c0_32, %c2_33, %c0_34] : memref<1x4x256xf32, #tpu.memory_space<vmem>>, vector<1x1x256xf32>
    %95 = vector.shape_cast %94 : vector<1x1x256xf32> to vector<1x256xf32>
    %96 = vector.shape_cast %93 : vector<1x256xf32> to vector<1x1x256xf32>
    tpu.vector_store %arg5[%c0_32, %c2_33, %c0_34], %96 {strides = array<i32>} : memref<1x4x256xf32, #tpu.memory_space<vmem>>, vector<1x1x256xf32>,
    %97 = vector.extract_strided_slice %0 {offsets = [0, 3, 0], sizes = [1, 1, 256], strides = [1, 1, 1]} : vector<1x4x256xf32> to vector<1x1x256xf32>
    %98 = vector.shape_cast %97 : vector<1x1x256xf32> to vector<1x256xf32>
    %c3_35 = arith.constant 3 : index
    %99 = memref.load %arg3[%c3_35] : memref<4xf32, #tpu.memory_space<smem>>
    %100 = vector.broadcast %99 : f32 to vector<1x256xf32>
    %101 = arith.addf %98, %100 : vector<1x256xf32>
    %c3_36 = arith.constant 3 : index
    %c0_37 = arith.constant 0 : index
    %102 = memref.load %arg2[%c3_36, %c0_37] : memref<4x4xf32, #tpu.memory_space<smem>>
    %103 = vector.extract_strided_slice %0 {offsets = [0, 0, 0], sizes = [1, 1, 256], strides = [1, 1, 1]} : vector<1x4x256xf32> to vector<1x1x256xf32>
    %104 = vector.shape_cast %103 : vector<1x1x256xf32> to vector<1x256xf32>
    %105 = vector.broadcast %102 : f32 to vector<1x256xf32>
    %106 = arith.mulf %105, %104 : vector<1x256xf32>
    %107 = arith.addf %101, %106 : vector<1x256xf32>
    %c3_38 = arith.constant 3 : index
    %c1_39 = arith.constant 1 : index
    %108 = memref.load %arg2[%c3_38, %c1_39] : memref<4x4xf32, #tpu.memory_space<smem>>
    %109 = vector.extract_strided_slice %0 {offsets = [0, 1, 0], sizes = [1, 1, 256], strides = [1, 1, 1]} : vector<1x4x256xf32> to vector<1x1x256xf32>
    %110 = vector.shape_cast %109 : vector<1x1x256xf32> to vector<1x256xf32>
    %111 = vector.broadcast %108 : f32 to vector<1x256xf32>
    %112 = arith.mulf %111, %110 : vector<1x256xf32>
    %113 = arith.addf %107, %112 : vector<1x256xf32>
    %c3_40 = arith.constant 3 : index
    %c2_41 = arith.constant 2 : index
    %114 = memref.load %arg2[%c3_40, %c2_41] : memref<4x4xf32, #tpu.memory_space<smem>>
    %115 = vector.extract_strided_slice %0 {offsets = [0, 2, 0], sizes = [1, 1, 256], strides = [1, 1, 1]} : vector<1x4x256xf32> to vector<1x1x256xf32>
    %116 = vector.shape_cast %115 : vector<1x1x256xf32> to vector<1x256xf32>
    %117 = vector.broadcast %114 : f32 to vector<1x256xf32>
    %118 = arith.mulf %117, %116 : vector<1x256xf32>
    %119 = arith.addf %113, %118 : vector<1x256xf32>
    %c3_42 = arith.constant 3 : index
    %c3_43 = arith.constant 3 : index
    %120 = memref.load %arg2[%c3_42, %c3_43] : memref<4x4xf32, #tpu.memory_space<smem>>
    %121 = vector.extract_strided_slice %0 {offsets = [0, 3, 0], sizes = [1, 1, 256], strides = [1, 1, 1]} : vector<1x4x256xf32> to vector<1x1x256xf32>
    %122 = vector.shape_cast %121 : vector<1x1x256xf32> to vector<1x256xf32>
    %123 = vector.broadcast %120 : f32 to vector<1x256xf32>
    %124 = arith.mulf %123, %122 : vector<1x256xf32>
    %125 = arith.addf %119, %124 : vector<1x256xf32>
    %c0_44 = arith.constant 0 : index
    %c3_45 = arith.constant 3 : index
    %c0_46 = arith.constant 0 : index
    %126 = vector.load %arg5[%c0_44, %c3_45, %c0_46] : memref<1x4x256xf32, #tpu.memory_space<vmem>>, vector<1x1x256xf32>
    %127 = vector.shape_cast %126 : vector<1x1x256xf32> to vector<1x256xf32>
    %128 = vector.shape_cast %125 : vector<1x256xf32> to vector<1x1x256xf32>
    tpu.vector_store %arg5[%c0_44, %c3_45, %c0_46], %128 {strides = array<i32>} : memref<1x4x256xf32, #tpu.memory_space<vmem>>, vector<1x1x256xf32>,
    return
  }
  func.func @transform_0(%arg0: i32, %arg1: i32) -> (i32, i32) {
    %c0_i32 = arith.constant 0 : i32
    %c0_i32_0 = arith.constant 0 : i32
    %c0_i32_1 = arith.constant 0 : i32
    return %c0_i32, %c0_i32_0 : i32, i32
  }
  func.func @transform_1(%arg0: i32, %arg1: i32) -> i32 {
    %c0_i32 = arith.constant 0 : i32
    %c0_i32_0 = arith.constant 0 : i32
    return %c0_i32 : i32
  }
  func.func @transform_2(%arg0: i32, %arg1: i32) -> (i32, i32, i32) {
    %c0_i32 = arith.constant 0 : i32
    %c0_i32_0 = arith.constant 0 : i32
    return %arg0, %c0_i32, %arg1 : i32, i32, i32
  }
  func.func @transform_3(%arg0: i32, %arg1: i32) -> (i32, i32, i32) {
    %c0_i32 = arith.constant 0 : i32
    %c0_i32_0 = arith.constant 0 : i32
    return %arg0, %c0_i32, %arg1 : i32, i32, i32
  }
}

</mosaic_0001>

<bundles_post_ra>
// kernel: tpu_custom_call.1
= control target key start
LH: loop header
LB: loop body
LE: loop exit
PB: predicated region body
PF: predicated region fallthrough
CT: control target
= control target key end

     0   :  { %8 = vsyncpa [#allocation5], 0  ;;  %s1012_s0 = inlined_call_operand.hbm [shape: f32[4,4], index: 0, kind: input, shape index: {}]   ;;  %s1013_s1 = inlined_call_operand.hbm [shape: f32[4], index: 1, kind: input, shape index: {}]   ;;  %s1014_s2 = inlined_call_operand.hbm [shape: f32[2,4,256], index: 2, kind: input, shape index: {}]   ;;  %s1015_s3 = inlined_call_operand.hbm [shape: f32[2,4,256], index: 3, kind: output, shape index: {}]  }
   0x1   :  { %9 = vsyncpa [#allocation7], 0 }
   0x2   :  { %10 = vsyncpa [#allocation3], 0 }
   0x3   :  { %12 = vsyncpa [#allocation3 + $0x1], 0 }
   0x4   :  { %13 = vsyncpa [#allocation4], 0 }
   0x5   :  { %15 = vsyncpa [#allocation4 + $0x1], 0  ;;  %s816_s12 = smov 0   ;;  %s818_s13 = smov 0  }
   0x6   :  { %s820_s14 = smov 0   ;;  %s822_s15 = smov 0  }
   0x7   :  { %s824_s16 = smov 0   ;;  %s826_s17 = smov 0  }
   0x8 LB: > { %s511_s18 = sadd.s32 4294967295, %s792_s17   ;;  %s512_s19 = sadd.s32 4294967294, %s792_s17   ;;  %s792_s17 = sphi %s826_s17, %s21_s17   ;;  %s788_s16 = sphi %s824_s16, %s1027_s16   ;;  %s784_s15 = sphi %s822_s15, %s1026_s15   ;;  %s780_s14 = sphi %s820_s14, %s1025_s14   ;;  %s776_s13 = sphi %s818_s13, %s1024_s13   ;;  %s772_s12 = sphi %s816_s12, %s1023_s12  }
   0x9   : > { %p97_p0 = scmp.ne.s32.totalorder %s776_s13, %s772_s12  ;;  %p850_p1 = scmp.eq.s32.totalorder %s511_s18, 0 }
   0xa   : > { %p129_p2 = scmp.eq.s32.totalorder %s512_s19, 1  ;;  %p513_p4 = scmp.ge.s32.totalorder %s792_s17, 1 }
   0xb   : > { %p856_p3 = por %p850_p1, %p97_p0  ;;  %p136_p6 = scmp.lt.s32.totalorder %s792_s17, 3 }
   0xc   : > { %p861_p5 = por %p129_p2, %p97_p0  ;;  %s148_s25 = sshll.u32 %s1012_s0, 4  ;;  %s149_s25 = int_to_ptr.hbm [resolvable:$true] %s148_s25 }
   0xd   : > { %p869_p7 = pnand %p513_p4, %p136_p6  ;;  %p516_p8 = scmp.ge.s32.totalorder %s792_s17, 2 }
   0xe   : > { %s158_s29 = sshll.u32 %s1013_s1, 4  ;;  %s794_s30 = smov [#allocation2]   ;;  %s159_s29 = int_to_ptr.hbm [resolvable:$true] %s158_s29 }
   0xf   : > { %p571_p9 = pneg %p869_p7  ;;  %s795_s4 = smov [#allocation6]  }
  0x10   : > { %p123_p11 = scmp.eq.s32.totalorder %s511_s18, 1  ;;  %s33_s5 = sadd.s32 1, %s788_s16 }
  0x11   : > { %p572_p10 = pnand %p571_p9, %p850_p1  ;;  %p35_p12 = scmp.ge.s32.totalorder %s33_s5, 2 }
  0x12   : > { %s84_s6 = sadd.s32 1, %s780_s14  ;;  %p91_p13 = scmp.ne.s32.totalorder %s780_s14, %s776_s13 }
  0x13   : > { %574 = dma.hbm_to_smem (!%p572_p10), %s149_s25, 64, %s794_s30, [#allocation5]  }
  0x14   : > { %577 = dma.hbm_to_smem (!%p572_p10), %s159_s29, 16, %s795_s4, [#allocation7]  }
  0x15   : > { %p92_p0 = scmp.eq.s32.totalorder %s792_s17, 0  ;;  %s1029_s5 = smov (%p35_p12, %s33_s5), 0 }
  0x16   : > { %p888_p2 = por %p123_p11, %p91_p13  ;;  %p588_p4 = scmp.lt.s32.totalorder %s792_s17, 2 }
  0x17   : > { %s79_s8 = ssub.s32 %s788_s16, %s1029_s5  ;;  %s169_s9 = sand.u32 1, %s780_s14  }
  0x18   : > { %p82_p6 = scmp.eq.s32.totalorder %s79_s8, 0  ;;  %p93_p9 = por %p92_p0, %p91_p13 }
  0x19   : > { %s517_s10 = sshll.u32 %s169_s9, 3  ;;  %s557_s11 = sshll.u32 %s788_s16, 3 }
  0x1a   : > { %s898_s18 = scalar_select %p82_p6, %s780_s14, %s84_s6  }
  0x1b   : > { %s180_s24 = scalar_lea.hbm %s1014_s2, %s557_s11  ;;  %s173_s27 = scalar_lea.vmem [#allocation8], %s517_s10 }
  0x1c   : > { %s182_s25 = sshll.u32 %s180_s24, 4  ;;  %s184_s28 = sshll.u32 %s173_s27, 4  ;;  %s183_s25 = int_to_ptr.hbm [resolvable:$true] %s182_s25  ;;  %s185_s28 = int_to_ptr.vmem [resolvable:$true] %s184_s28 }
  0x1d   : > { %p579_p10 = pnand %p588_p4, %p93_p9  ;;  %s170_s29 = scalar_lea.sflag [#allocation3], %s169_s9 }
  0x1e   : > { %193 = sbr.rel (%p869_p7) target bundleno = 93 (0x5d), region = 32 }
  0x1f   : > { %581 = dma.hbm_to_vmem [thread:$0]  (!%p579_p10), %s183_s25, 128, %s185_s28, %s170_s29  }
  0x23   : > { %755 = dma.done.wait (%p850_p1), [#allocation5], 64  }
  0x24   : > { %757 = vsyncadd (%p850_p1), [#allocation5], 4294967232 }
  0x25   : > { %759 = dma.done.wait (%p850_p1), [#allocation7], 16  }
  0x26   : > { %761 = vsyncadd (%p850_p1), [#allocation7], 4294967280  ;;  %s916_s30 = sand.u32 1, %s776_s13  }
  0x27   : > { %s523_s26 = sshll.u32 %s916_s30, 3  ;;  %s206_s4 = scalar_lea.sflag [#allocation3], %s916_s30 }
  0x28   : > { %s209_s6 = scalar_lea.vmem [#allocation8], %s523_s26 }
  0x29   : > { %763 = dma.done.wait (%p856_p3), %s206_s4, 128  }
  0x2a   : > { %765 = vsyncadd (%p856_p3), %s206_s4, 4294967168 }
  0x2b   : > { %215 = sfence }
  0x2c   : > { %s531_s8 = sld [smem:[#allocation6 + $0x1]]  ;;  %v926_v0 = vld [vmem:[%s209_s6] sm:$0xff]  ;;  %v273_v39 = vlaneseq  ;;  %vm270_vm1 = vcmask 1040384  }
  0x2d   : > { %s532_s20 = sld [smem:[#allocation2 + $0x80]] }
  0x2e   : > { %s533_s9 = sld [smem:[#allocation2 + $0x81]]  ;;  %vm955_vm0 = vcmp.lt.s32.totalorder %v273_v39, 256 }
  0x2f   : > { %s534_s10 = sld [smem:[#allocation2 + $0x82]] }
  0x30   : > { %s536_s11 = sld [smem:[#allocation2 + $0x83]] }
  0x31   : > { %s539_s19 = sld [smem:[#allocation6 + $0x2]] }
  0x32   : > { %v279_v1 = vstv %s531_s8  ;;  %s540_s23 = sld [smem:[#allocation2 + $0x100]] }
  0x33   : > { %v282_v2 = vstv %s532_s20  ;;  %s541_s24 = sld [smem:[#allocation2 + $0x101]]  ;;  %v280_v3 = vadd.f32 %v279_v1, %v926_v0 }
  0x34   : > { %v283_v4 = vmul.f32 %v282_v2, %v926_v0  ;;  %v289_v5 = vstv %s533_s9  ;;  %s930_s21 = sld [smem:[#allocation2 + $0x102]] }
  0x35   : > { %v293_v6 = vstv %s534_s10  ;;  %s932_s25 = sld [smem:[#allocation2 + $0x103]]  ;;  %v290_v8 = vmul.f32 %v289_v5, %v926_v0 }
  0x36   : > { %v285_v7 = vrot.slane %v283_v4, 7  ;;  %v294_v9 = vmul.f32 %v293_v6, %v926_v0  ;;  %v301_v10 = vstv %s536_s11  ;;  %s546_s27 = sld [smem:[#allocation6 + $0x3]] }
  0x37   : > { %v302_v11 = vmul.f32 %v301_v10, %v926_v0  ;;  %v316_v12 = vstv %s539_s19  ;;  %s547_s28 = sld [smem:[#allocation2 + $0x180]]  ;;  %s233_s19 = scalar_lea.vmem [#allocation9], %s523_s26 }
  0x38   : > { %v287_v13 = vadd.f32 %v285_v7, %v280_v3  ;;  %v535_v14 = vrot.slane %v294_v9, 9  ;;  %v319_v15 = vstv %s540_s23  ;;  %s548_s29 = sld [smem:[#allocation2 + $0x181]]  ;;  %v317_v16 = vadd.f32 %v316_v12, %v926_v0  ;;  %s558_s23 = sshll.u32 %s784_s15, 3 }
  0x39   : > { %v320_v17 = vmul.f32 %v319_v15, %v926_v0  ;;  %v326_v18 = vstv %s541_s24  ;;  %s939_s4 = sld [smem:[#allocation2 + $0x182]]  ;;  %v537_v20 = vrot.slane %v302_v11, 10  ;;  %s387_s15 = scalar_lea.sflag [#allocation4], %s916_s30 }
  0x3a   : > { %v291_v19 = vadd.f32 %v290_v8, %v287_v13  ;;  %v327_v21 = vmul.f32 %v326_v18, %v926_v0  ;;  %v333_v22 = vstv %s930_s21  ;;  %s943_s6 = sld [smem:[#allocation2 + $0x183]]  ;;  %s400_s21 = scalar_lea.hbm %s1015_s3, %s558_s23 }
  0x3b   : > { %v322_v23 = vrot.slane %v320_v17, 6  ;;  %v337_v24 = vstv %s932_s25  ;;  %s237_s8 = sld [smem:[#allocation6]]  ;;  %v334_v29 = vmul.f32 %v333_v22, %v926_v0  ;;  %s402_s25 = sshll.u32 %s233_s19, 4  ;;  %s403_s25 = int_to_ptr.vmem [resolvable:$true] %s402_s25 }
  0x3c   : > { %v299_v25 = vadd.f32 %v535_v14, %v291_v19  ;;  %v329_v26 = vrot.slane %v327_v21, 7  ;;  %v352_v27 = vstv %s546_s27  ;;  %s240_s20 = sld [smem:[#allocation2]]  ;;  %v338_v30 = vmul.f32 %v337_v24, %v926_v0  ;;  %s404_s27 = sshll.u32 %s400_s21, 4  ;;  %s405_s27 = int_to_ptr.hbm [resolvable:$true] %s404_s27 }
  0x3d   : > { %v324_v28 = vadd.f32 %v322_v23, %v317_v16  ;;  %v355_v31 = vstv %s547_s28  ;;  %s525_s9 = sld [smem:[#allocation2 + $0x1]]  ;;  %v353_v33 = vadd.f32 %v352_v27, %v926_v0  ;;  %s716_s28 = sshra.s32 %s405_s27, 4  ;;  %s717_s28 = int_to_ptr.hbm [resolvable:$true] %s716_s28 }
  0x3e   : > { %v307_v32 = vadd.f32 %v537_v20, %v299_v25  ;;  %v356_v34 = vmul.f32 %v355_v31, %v926_v0  ;;  %v362_v35 = vstv %s548_s29  ;;  %s527_s10 = sld [smem:[#allocation2 + $0x2]]  ;;  %v544_v42 = vrot.slane %v338_v30, 9  ;;  %s718_s29 = scalar_lea.hbm %s717_s28, 8 }
  0x3f   : > { %v331_v36 = vadd.f32 %v329_v26, %v324_v28  ;;  %v363_v37 = vmul.f32 %v362_v35, %v926_v0  ;;  %v369_v38 = vstv %s939_s4  ;;  %s529_s11 = sld [smem:[#allocation2 + $0x3]]  ;;  %p719_p1 = scmp.ne.s32.totalorder %s717_s28, %s718_s29 }
  0x40   : > { %309 = vst [vmem:[#allocation1] sm:$0xff] %v307_v32  ;;  %v358_v40 = vrot.slane %v356_v34, 5  ;;  %v370_v43 = vmul.f32 %v369_v38, %v926_v0  ;;  %v376_v63 = vstv %s943_s6  ;;  %p723_p11 = scmp.lt.s32.totalorder %s717_s28, %s1015_s3 }
  0x41   : > { %v335_v41 = vadd.f32 %v334_v29, %v331_v36  ;;  %v238_v44 = vstv %s237_s8  ;;  %v365_v46 = vrot.slane %v363_v37, 6  ;;  %v377_v5 = vmul.f32 %v376_v63, %v926_v0  ;;  %p720_p3 = pnand %p719_p1, %p888_p2  ;;  %s722_s8 = scalar_lea.hbm %s1015_s3, 16 }
  0x42   : > { %v360_v45 = vadd.f32 %v358_v40, %v353_v33  ;;  %v239_v47 = vadd.f32 %v238_v44, %v926_v0  ;;  %v241_v48 = vstv %s240_s20  ;;  %v372_v59 = vrot.slane %v370_v43, 7  ;;  %p724_p12 = scmp.lt.s32.totalorder %s722_s8, %s718_s29 }
  0x43   : > { %v242_v49 = vmul.f32 %v241_v48, %v926_v0  ;;  %v245_v50 = vstv %s525_s9  ;;  %v343_v54 = vadd.f32 %v544_v42, %v335_v41  ;;  %p721_p7 = pneg %p720_p3 }
  0x44   : > { %v246_v52 = vmul.f32 %v245_v50, %v926_v0  ;;  %v253_v53 = vstv %s527_s10  ;;  %v367_v58 = vadd.f32 %v365_v46, %v360_v45  ;;  %p725_p13 = por %p724_p12, %p723_p11 }
  0x45   : > { %v243_v55 = vadd.f32 %v242_v49, %v239_v47  ;;  %v254_v56 = vmul.f32 %v253_v53, %v926_v0  ;;  %v261_v57 = vstv %s529_s11 }
  0x46   : > { %v526_v60 = vrot.slane %v246_v52, 9  ;;  %v262_v61 = vmul.f32 %v261_v57, %v926_v0  ;;  %v374_v4 = vadd.f32 %v372_v59, %v367_v58  ;;  %p726_p0 = pnand %p725_p13, %p721_p7 }
  0x47   : > { %v311_v62 = vld [vmem:[#allocation1 + $0x1] ss:$4 sm:$0xff]  ;;  %v528_v1 = vrot.slane %v254_v56, 10 }
  0x48   : > { %538 = vst.msk [vmem:[%s233_s19 + $0x1] ss:$4 sm:$0x3] %vm955_vm0, %v311_v62  ;;  %v251_v2 = vadd.f32 %v526_v60, %v243_v55  ;;  %v530_v3 = vrot.slane %v262_v61, 11  ;;  %v378_v8 = vadd.f32 %v377_v5, %v374_v4 }
  0x49   : > { %345 = vst [vmem:[#allocation1] sm:$0xff] %v343_v54 }
  0x4a   : > { %v259_v6 = vadd.f32 %v528_v1, %v251_v2 }
  0x4c   : > { %v267_v7 = vadd.f32 %v530_v3, %v259_v6 }
  0x4e   : > { %v269_v9 = vrot.slane %v267_v7, 3 }
  0x50   : > { %v347_v10 = vld [vmem:[#allocation1 + $0x2] ss:$4 sm:$0xff]  ;;  %v271_v11 = vsel %vm270_vm1, %v267_v7, %v269_v9 }
  0x51   : > { %545 = vst.msk [vmem:[%s233_s19 + $0x2] ss:$4 sm:$0x3] %vm955_vm0, %v347_v10 }
  0x52   : > { %380 = vst [vmem:[#allocation1] sm:$0xff] %v378_v8 }
  0x53   : > { %277 = vst.msk [vmem:[%s233_s19] ss:$4 sm:$0x3] %vm955_vm0, %v271_v11 }
  0x59   : > { %v382_v0 = vld [vmem:[#allocation1 + $0x3] ss:$4 sm:$0xff] }
  0x5a   : > { %551 = vst.msk [vmem:[%s233_s19 + $0x3] ss:$4 sm:$0x3] %vm955_vm0, %v382_v0 }
  0x5b   : > { %729 = shalt.err (!%p726_p0)
}
  0x5c   : > { %569 = dma.vmem_to_hbm [thread:$0]  (%p888_p2), %s403_s25, 128, %s405_s27, %s387_s15  }
  0x5d PF: > { %s416_s30 = sand.u32 1, %s772_s12   ;;  %p583_p4 = pnand %p516_p8, %p861_p5 }
  0x5e   : > { %s417_s10 = scalar_lea.sflag [#allocation4], %s416_s30 }
  0x5f   : > { %p584_p6 = pneg %p583_p4 }
  0x61   : > { %767 = dma.done.wait (%p584_p6), %s417_s10, 128  }
  0x62   : > { %769 = vsyncadd (%p584_p6), %s417_s10, 4294967168  ;;  %s21_s17 = sadd.s32 1, %s792_s17   ;;  %s1023_s12 = smov %s776_s13 }
  0x63   : > { %p18_p9 = scmp.ge.s32.totalorder %s21_s17, 4   ;;  %s1024_s13 = smov %s780_s14 }
  0x64   : > { %s1025_s14 = smov %s898_s18  ;;  %s1026_s15 = smov %s788_s16 }
  0x65   : > { %s1027_s16 = smov %s1029_s5  ;;  %20 = sbr.rel (!%p18_p9) target bundleno = 8 (0x8), region = 92 }
  0x6a   :  { %423 = vsyncpa [#allocation3], 1 }
  0x6b   :  { %425 = vsyncpa [#allocation3 + $0x1], 1 }
  0x6c   :  { %426 = vsyncpa [#allocation4], 1 }
  0x6d   :  { %428 = vsyncpa [#allocation4 + $0x1], 1 }
  0x6e   :  { %429 = vsyncpa [#allocation5], 1 }
  0x6f   :  { %431 = vsyncpa [#allocation5 + $0x1], 1 }
  0x70   :  { %432 = vsyncpa [#allocation7], 1 }

</bundles_post_ra>
